<compile_context>
chip_gen: v7x
topology: tpu7x:2x2x1
jax: 0.10.0
libtpu: 0.0.40
codegen_flags: <defaults>
</compile_context>

<pallas_src>
import functools

import jax
import jax.numpy as jnp
from jax.experimental import pallas as pl
from jax.experimental.pallas import tpu as pltpu


def _round_up(x, m):
    return (x + m - 1) // m * m


# --------------------------------------------------------------------------
# Kernel: shared MLP (S->128->64, ReLU) + fused lane-dense sigmoid head.
# --------------------------------------------------------------------------
def _policy_kernel(x_ref, w1_ref, b1_ref, w2_ref, b2_ref, wh_ref, bh_ref,
                   scale_ref, off_ref, out_ref):
    # x arrives f32; cast to bf16 in-register for the MXU (no host-side pass).
    x = x_ref[...].astype(jnp.bfloat16)                               # (TB, S)

    h1 = jnp.dot(x, w1_ref[...], preferred_element_type=jnp.float32) + b1_ref[...]
    h1 = jnp.maximum(h1, 0.0)                                         # (TB, 128)

    h2 = jnp.dot(h1.astype(jnp.bfloat16), w2_ref[...],
                 preferred_element_type=jnp.float32) + b2_ref[...]
    h2 = jnp.maximum(h2, 0.0)                                         # (TB, 64)

    # Fused head: cols [0, nc) = alpha logits, col nc = lambda logit, rest pad.
    logits = jnp.dot(h2.astype(jnp.bfloat16), wh_ref[...],
                     preferred_element_type=jnp.float32) + bh_ref[...]
    s = jax.nn.sigmoid(logits)                                        # (TB, NH)

    # Per-column epilogue via precomputed scale/offset (no iota/compare/where).
    out_ref[...] = (s * scale_ref[...] + off_ref[...]).astype(out_ref.dtype)


# --------------------------------------------------------------------------
# One-time parameter preparation (hoisted out of the forward path).
# --------------------------------------------------------------------------
def prepare_params(params):
    """Fuse alpha/lambda heads into one zero-padded lane-dense weight, cast
    matmul weights to bf16, and precompute the epilogue scale/offset vectors.
    Call once; reuse the result for every forward pass."""
    num_classes = params["wa"].shape[1]
    NH = max(128, _round_up(num_classes + 1, 128))

    wh = jnp.zeros((64, NH), jnp.float32).at[:, :num_classes].set(params["wa"])
    wh = wh.at[:, num_classes].set(params["wl"][:, 0])
    bh = jnp.zeros((1, NH), jnp.float32).at[:, :num_classes].set(params["ba"])
    bh = bh.at[:, num_classes].set(params["bl"][:, 0])

    # alpha cols: sigmoid*1 + 1.0 ; lambda col: sigmoid*10 + 1e-8 ; pad: *0 + 0
    scale = jnp.zeros((1, NH), jnp.float32).at[:, :num_classes].set(1.0)
    scale = scale.at[:, num_classes].set(10.0)
    offset = jnp.zeros((1, NH), jnp.float32).at[:, :num_classes].set(1.0)
    offset = offset.at[:, num_classes].set(1e-8)

    return dict(
        w1=params["w1"].astype(jnp.bfloat16), b1=params["b1"],
        w2=params["w2"].astype(jnp.bfloat16), b2=params["b2"],
        wh=wh.astype(jnp.bfloat16), bh=bh,
        scale=scale, offset=offset,
        num_classes=num_classes,
    )


def _choose_batch_tile(B, tb):
    """Pick the batch tile: multiple of 8 (f32 sublanes), big by default, and
    guaranteeing >= 2 grid steps when the batch is large enough that v7x's
    second TensorCore should not sit idle."""
    tb = max(8, (int(tb) // 8) * 8)          # defensive clamp to a multiple of 8
    if B > tb:
        return tb                            # grid already has >= 2 steps
    TB = _round_up(max(B, 1), 8)
    if B >= 512:                             # worth splitting across 2 TCs (v7x)
        TB = _round_up(pl.cdiv(B, 2), 8)
    return TB


# --------------------------------------------------------------------------
# Forward pass.
# --------------------------------------------------------------------------
@functools.partial(jax.jit, static_argnames=("num_classes", "tb", "out_dtype"))
def _forward_impl(x, w1, b1, w2, b2, wh, bh, scale, offset, *,
                  num_classes, tb, out_dtype):
    B, state_dim = x.shape
    NH = wh.shape[1]
    TB = _choose_batch_tile(B, tb)
    grid = (pl.cdiv(B, TB),)                 # ragged last block handled by Pallas

    resident = lambda i: (0, 0)              # weights stay resident across tiles

    # Per-step VMEM estimate (double-buffered x/out tiles + f32 intermediates
    # + weights); clamp the scoped limit to [32 MiB default, 64 MiB v7x physical].
    est = 2 * TB * (state_dim + NH) * 4 + 6 * TB * 128 * 4 + (1 << 20)
    vmem_limit = min(max(int(est * 3) // 2, 32 << 20), 64 << 20)

    out = pl.pallas_call(
        _policy_kernel,
        out_shape=jax.ShapeDtypeStruct((B, NH), out_dtype),
        grid=grid,
        in_specs=[
            pl.BlockSpec((TB, state_dim), lambda i: (i, 0)),   # x tile (f32)
            pl.BlockSpec((state_dim, 128), resident),          # w1 (bf16)
            pl.BlockSpec((1, 128), resident),                  # b1 (f32)
            pl.BlockSpec((128, 64), resident),                 # w2 (bf16)
            pl.BlockSpec((1, 64), resident),                   # b2 (f32)
            pl.BlockSpec((64, NH), resident),                  # fused head W (bf16)
            pl.BlockSpec((1, NH), resident),                   # fused head b (f32)
            pl.BlockSpec((1, NH), resident),                   # epilogue scale
            pl.BlockSpec((1, NH), resident),                   # epilogue offset
        ],
        out_specs=pl.BlockSpec((TB, NH), lambda i: (i, 0)),
        compiler_params=pltpu.CompilerParams(
            dimension_semantics=("parallel",),
            vmem_limit_bytes=vmem_limit),
    )(x, w1, b1, w2, b2, wh, bh, scale, offset)

    alpha = out[:, :num_classes]
    # PyTorch: lambda_kl.squeeze() -> (B,) for B > 1, scalar for B == 1.
    lam = jnp.squeeze(out[:, num_classes])
    return alpha, lam


def policy_network_forward(x, prepped, *, tb=2048, out_dtype=jnp.float32):
    """PolicyNetwork forward.  `prepped` comes from prepare_params(params)."""
    return _forward_impl(
        x, prepped["w1"], prepped["b1"], prepped["w2"], prepped["b2"],
        prepped["wh"], prepped["bh"], prepped["scale"], prepped["offset"],
        num_classes=prepped["num_classes"], tb=tb, out_dtype=out_dtype)


# --------------------------------------------------------------------------
# Synthetic parameter init (shapes match the nn.Linear definitions).
# --------------------------------------------------------------------------
def init_params(key, state_dim, num_classes):
    ks = jax.random.split(key, 8)

    def lin(kw, kb, fan_in, fan_out):
        bound = 1.0 / jnp.sqrt(float(fan_in))
        w = jax.random.uniform(kw, (fan_in, fan_out), jnp.float32, -bound, bound)
        b = jax.random.uniform(kb, (1, fan_out), jnp.float32, -bound, bound)
        return w, b

    w1, b1 = lin(ks[0], ks[1], state_dim, 128)
    w2, b2 = lin(ks[2], ks[3], 128, 64)
    wa, ba = lin(ks[4], ks[5], 64, num_classes)
    wl, bl = lin(ks[6], ks[7], 64, 1)
    return dict(w1=w1, b1=b1, w2=w2, b2=b2, wa=wa, ba=ba, wl=wl, bl=bl)


if __name__ == "__main__":
    key = jax.random.PRNGKey(0)
    k_param, k_x = jax.random.split(key)

    B, state_dim, num_classes = 8, 32, 4
    params = init_params(k_param, state_dim, num_classes)
    x = jax.random.normal(k_x, (B, state_dim), jnp.float32)

    prepped = prepare_params(params)                 # one-time prep, reused below
    alpha_prior, lambda_kl = policy_network_forward(x, prepped)
    jax.block_until_ready((alpha_prior, lambda_kl))

    # Reference with the same bf16-operand / f32-accumulate matmul math.
    def bf16_dot(a, w):
        return jnp.dot(a.astype(jnp.bfloat16), w.astype(jnp.bfloat16),
                       preferred_element_type=jnp.float32)

    h1 = jnp.maximum(bf16_dot(x, params["w1"]) + params["b1"], 0.0)
    h2 = jnp.maximum(bf16_dot(h1, params["w2"]) + params["b2"], 0.0)
    alpha_ref = jax.nn.sigmoid(bf16_dot(h2, params["wa"]) + params["ba"]) + 1.0
    lam_ref = jnp.squeeze(
        jax.nn.sigmoid(bf16_dot(h2, params["wl"]) + params["bl"]) * 10.0 + 1e-08)

    # Loose sanity check against the full-f32 (PyTorch-equivalent) math.
    h1f = jnp.maximum(x @ params["w1"] + params["b1"], 0.0)
    h2f = jnp.maximum(h1f @ params["w2"] + params["b2"], 0.0)
    alpha_f32 = jax.nn.sigmoid(h2f @ params["wa"] + params["ba"]) + 1.0
    lam_f32 = jnp.squeeze(
        jax.nn.sigmoid(h2f @ params["wl"] + params["bl"]) * 10.0 + 1e-08)

    assert alpha_prior.shape == (B, num_classes)
    assert lambda_kl.shape == (B,)
    assert jnp.allclose(alpha_prior, alpha_ref, atol=1e-3, rtol=1e-3)
    assert jnp.allclose(lambda_kl, lam_ref, atol=1e-3, rtol=1e-3)
    assert jnp.allclose(alpha_prior, alpha_f32, atol=5e-2)
    assert jnp.allclose(lambda_kl, lam_f32, atol=5e-2)

    print("KERNEL_OK")
</pallas_src>

<mosaic_0001>
module attributes {stable_mosaic.version = 11 : i64} {
  func.func @_policy_kernel(%arg0: i32, %arg1: memref<8x32xf32, #tpu.memory_space<vmem>>, %arg2: memref<32x128xbf16, #tpu.memory_space<vmem>>, %arg3: memref<1x128xf32, #tpu.memory_space<vmem>>, %arg4: memref<128x64xbf16, #tpu.memory_space<vmem>>, %arg5: memref<1x64xf32, #tpu.memory_space<vmem>>, %arg6: memref<64x128xbf16, #tpu.memory_space<vmem>>, %arg7: memref<1x128xf32, #tpu.memory_space<vmem>>, %arg8: memref<1x128xf32, #tpu.memory_space<vmem>>, %arg9: memref<1x128xf32, #tpu.memory_space<vmem>>, %arg10: memref<8x128xf32, #tpu.memory_space<vmem>>) attributes {dimension_semantics = [#tpu.dimension_semantics<parallel>], iteration_bounds = array<i64: 1>, scalar_prefetch = 0 : i64, scratch_operands = 0 : i64, tpu.core_type = #tpu.core_type<tc>, window_params = [{transform_indices = @transform_0, window_bounds = array<i64: 8, 32>}, {pipeline_mode = #tpu.pipeline_mode<synchronous>, transform_indices = @transform_1, window_bounds = array<i64: 32, 128>}, {pipeline_mode = #tpu.pipeline_mode<synchronous>, transform_indices = @transform_2, window_bounds = array<i64: 1, 128>}, {pipeline_mode = #tpu.pipeline_mode<synchronous>, transform_indices = @transform_3, window_bounds = array<i64: 128, 64>}, {pipeline_mode = #tpu.pipeline_mode<synchronous>, transform_indices = @transform_4, window_bounds = array<i64: 1, 64>}, {pipeline_mode = #tpu.pipeline_mode<synchronous>, transform_indices = @transform_5, window_bounds = array<i64: 64, 128>}, {pipeline_mode = #tpu.pipeline_mode<synchronous>, transform_indices = @transform_6, window_bounds = array<i64: 1, 128>}, {pipeline_mode = #tpu.pipeline_mode<synchronous>, transform_indices = @transform_7, window_bounds = array<i64: 1, 128>}, {pipeline_mode = #tpu.pipeline_mode<synchronous>, transform_indices = @transform_8, window_bounds = array<i64: 1, 128>}, {transform_indices = @transform_9, window_bounds = array<i64: 8, 128>}]} {
    %c0 = arith.constant 0 : index
    %c0_0 = arith.constant 0 : index
    %0 = vector.load %arg1[%c0, %c0_0] : memref<8x32xf32, #tpu.memory_space<vmem>>, vector<8x32xf32>
    %1 = arith.truncf %0 : vector<8x32xf32> to vector<8x32xbf16>
    %c0_1 = arith.constant 0 : index
    %c0_2 = arith.constant 0 : index
    %2 = vector.load %arg2[%c0_1, %c0_2] : memref<32x128xbf16, #tpu.memory_space<vmem>>, vector<32x128xbf16>
    %cst = arith.constant dense<0.000000e+00> : vector<8x128xf32>
    %3 = tpu.matmul %1, %2, %cst {dimension_numbers = #tpu.dot_dimension_numbers<[1], [0], [0], [1], [0, 0, 1, 1], [], []>} : vector<8x32xbf16>, vector<32x128xbf16>, vector<8x128xf32> -> vector<8x128xf32>
    %c0_3 = arith.constant 0 : index
    %c0_4 = arith.constant 0 : index
    %4 = vector.load %arg3[%c0_3, %c0_4] : memref<1x128xf32, #tpu.memory_space<vmem>>, vector<1x128xf32>
    %5 = vector.broadcast %4 : vector<1x128xf32> to vector<8x128xf32>
    %6 = arith.addf %3, %5 : vector<8x128xf32>
    %cst_5 = arith.constant 0.000000e+00 : f32
    %7 = vector.broadcast %cst_5 : f32 to vector<8x128xf32>
    %8 = arith.maximumf %6, %7 : vector<8x128xf32>
    %9 = arith.truncf %8 : vector<8x128xf32> to vector<8x128xbf16>
    %c0_6 = arith.constant 0 : index
    %c0_7 = arith.constant 0 : index
    %10 = vector.load %arg4[%c0_6, %c0_7] : memref<128x64xbf16, #tpu.memory_space<vmem>>, vector<128x64xbf16>
    %cst_8 = arith.constant dense<0.000000e+00> : vector<8x64xf32>
    %11 = tpu.matmul %9, %10, %cst_8 {dimension_numbers = #tpu.dot_dimension_numbers<[1], [0], [0], [1], [0, 0, 1, 1], [], []>} : vector<8x128xbf16>, vector<128x64xbf16>, vector<8x64xf32> -> vector<8x64xf32>
    %c0_9 = arith.constant 0 : index
    %c0_10 = arith.constant 0 : index
    %12 = vector.load %arg5[%c0_9, %c0_10] : memref<1x64xf32, #tpu.memory_space<vmem>>, vector<1x64xf32>
    %13 = vector.broadcast %12 : vector<1x64xf32> to vector<8x64xf32>
    %14 = arith.addf %11, %13 : vector<8x64xf32>
    %cst_11 = arith.constant 0.000000e+00 : f32
    %15 = vector.broadcast %cst_11 : f32 to vector<8x64xf32>
    %16 = arith.maximumf %14, %15 : vector<8x64xf32>
    %17 = arith.truncf %16 : vector<8x64xf32> to vector<8x64xbf16>
    %c0_12 = arith.constant 0 : index
    %c0_13 = arith.constant 0 : index
    %18 = vector.load %arg6[%c0_12, %c0_13] : memref<64x128xbf16, #tpu.memory_space<vmem>>, vector<64x128xbf16>
    %cst_14 = arith.constant dense<0.000000e+00> : vector<8x128xf32>
    %19 = tpu.matmul %17, %18, %cst_14 {dimension_numbers = #tpu.dot_dimension_numbers<[1], [0], [0], [1], [0, 0, 1, 1], [], []>} : vector<8x64xbf16>, vector<64x128xbf16>, vector<8x128xf32> -> vector<8x128xf32>
    %c0_15 = arith.constant 0 : index
    %c0_16 = arith.constant 0 : index
    %20 = vector.load %arg7[%c0_15, %c0_16] : memref<1x128xf32, #tpu.memory_space<vmem>>, vector<1x128xf32>
    %21 = vector.broadcast %20 : vector<1x128xf32> to vector<8x128xf32>
    %22 = arith.addf %19, %21 : vector<8x128xf32>
    %23 = arith.negf %22 : vector<8x128xf32>
    %24 = math.exp %23 : vector<8x128xf32>
    %cst_17 = arith.constant 1.000000e+00 : f32
    %25 = vector.broadcast %cst_17 : f32 to vector<8x128xf32>
    %26 = arith.addf %25, %24 : vector<8x128xf32>
    %27 = arith.divf %25, %26 : vector<8x128xf32>
    %c0_18 = arith.constant 0 : index
    %c0_19 = arith.constant 0 : index
    %28 = vector.load %arg8[%c0_18, %c0_19] : memref<1x128xf32, #tpu.memory_space<vmem>>, vector<1x128xf32>
    %29 = vector.broadcast %28 : vector<1x128xf32> to vector<8x128xf32>
    %30 = arith.mulf %27, %29 : vector<8x128xf32>
    %c0_20 = arith.constant 0 : index
    %c0_21 = arith.constant 0 : index
    %31 = vector.load %arg9[%c0_20, %c0_21] : memref<1x128xf32, #tpu.memory_space<vmem>>, vector<1x128xf32>
    %32 = vector.broadcast %31 : vector<1x128xf32> to vector<8x128xf32>
    %33 = arith.addf %30, %32 : vector<8x128xf32>
    %c0_22 = arith.constant 0 : index
    %c0_23 = arith.constant 0 : index
    %34 = vector.load %arg10[%c0_22, %c0_23] : memref<8x128xf32, #tpu.memory_space<vmem>>, vector<8x128xf32>
    tpu.vector_store %arg10[%c0_22, %c0_23], %33 {strides = array<i32>} : memref<8x128xf32, #tpu.memory_space<vmem>>, vector<8x128xf32>,
    return
  }
  func.func @transform_0(%arg0: i32) -> (i32, i32) {
    %c0_i32 = arith.constant 0 : i32
    %c0_i32_0 = arith.constant 0 : i32
    return %arg0, %c0_i32 : i32, i32
  }
  func.func @transform_1(%arg0: i32) -> (i32, i32) {
    %c0_i32 = arith.constant 0 : i32
    %c0_i32_0 = arith.constant 0 : i32
    %c0_i32_1 = arith.constant 0 : i32
    return %c0_i32, %c0_i32_0 : i32, i32
  }
  func.func @transform_2(%arg0: i32) -> (i32, i32) {
    %c0_i32 = arith.constant 0 : i32
    %c0_i32_0 = arith.constant 0 : i32
    %c0_i32_1 = arith.constant 0 : i32
    return %c0_i32, %c0_i32_0 : i32, i32
  }
  func.func @transform_3(%arg0: i32) -> (i32, i32) {
    %c0_i32 = arith.constant 0 : i32
    %c0_i32_0 = arith.constant 0 : i32
    %c0_i32_1 = arith.constant 0 : i32
    return %c0_i32, %c0_i32_0 : i32, i32
  }
  func.func @transform_4(%arg0: i32) -> (i32, i32) {
    %c0_i32 = arith.constant 0 : i32
    %c0_i32_0 = arith.constant 0 : i32
    %c0_i32_1 = arith.constant 0 : i32
    return %c0_i32, %c0_i32_0 : i32, i32
  }
  func.func @transform_5(%arg0: i32) -> (i32, i32) {
    %c0_i32 = arith.constant 0 : i32
    %c0_i32_0 = arith.constant 0 : i32
    %c0_i32_1 = arith.constant 0 : i32
    return %c0_i32, %c0_i32_0 : i32, i32
  }
  func.func @transform_6(%arg0: i32) -> (i32, i32) {
    %c0_i32 = arith.constant 0 : i32
    %c0_i32_0 = arith.constant 0 : i32
    %c0_i32_1 = arith.constant 0 : i32
    return %c0_i32, %c0_i32_0 : i32, i32
  }
  func.func @transform_7(%arg0: i32) -> (i32, i32) {
    %c0_i32 = arith.constant 0 : i32
    %c0_i32_0 = arith.constant 0 : i32
    %c0_i32_1 = arith.constant 0 : i32
    return %c0_i32, %c0_i32_0 : i32, i32
  }
  func.func @transform_8(%arg0: i32) -> (i32, i32) {
    %c0_i32 = arith.constant 0 : i32
    %c0_i32_0 = arith.constant 0 : i32
    %c0_i32_1 = arith.constant 0 : i32
    return %c0_i32, %c0_i32_0 : i32, i32
  }
  func.func @transform_9(%arg0: i32) -> (i32, i32) {
    %c0_i32 = arith.constant 0 : i32
    %c0_i32_0 = arith.constant 0 : i32
    return %arg0, %c0_i32 : i32, i32
  }
}

</mosaic_0001>

<bundles_post_ra>
// kernel: _forward_impl.1
= control target key start
LH: loop header
LB: loop body
LE: loop exit
PB: predicated region body
PF: predicated region fallthrough
CT: control target
= control target key end

     0   :  { %v426_v0 = vmov 0.0   ;;  %vm427_vm0 = vmmov 0   ;;  %vm58_vm1 = vcmask 261120   ;;  %vm256_vm2 = vcmask 523264   ;;  %s544_s1 = inlined_call_operand.vmem [shape: bf16[32,128], index: 1, kind: input, shape index: {}]   ;;  %s545_s0 = inlined_call_operand.vmem [shape: f32[8,32], index: 0, kind: input, shape index: {}]   ;;  %s546_s3 = inlined_call_operand.vmem [shape: bf16[128,64], index: 3, kind: input, shape index: {}]   ;;  %s547_s5 = inlined_call_operand.vmem [shape: bf16[64,128], index: 5, kind: input, shape index: {}]   ;;  %s548_s2 = inlined_call_operand.vmem [shape: f32[1,128], index: 2, kind: input, shape index: {}]   ;;  %s549_s4 = inlined_call_operand.vmem [shape: f32[1,64], index: 4, kind: input, shape index: {}]   ;;  %s550_s6 = inlined_call_operand.vmem [shape: f32[1,128], index: 6, kind: input, shape index: {}]   ;;  %s551_s7 = inlined_call_operand.vmem [shape: f32[1,128], index: 7, kind: input, shape index: {}]   ;;  %s552_s8 = inlined_call_operand.vmem [shape: f32[1,128], index: 8, kind: input, shape index: {}]   ;;  %s553_s9 = inlined_call_operand.vmem [shape: f32[8,128], index: 9, kind: output, shape index: {}]  }
   0x1   :  { %366 = vmatprep.subr.bf16.mxu0 %v426_v0  ;;  %v408_v1 = vld [vmem:[%s544_s1] sm:$0xff]   ;;  %370 = vmatprep.mubr.msk.bf16.mxu0 %vm427_vm0, %v426_v0  ;;  %v409_v2 = vld [vmem:[%s544_s1 + $0x8] sm:$0xff]   ;;  %v412_v7 = vld [vmem:[%s546_s3 + $0x10] sm:$0xff]  }
   0x2   :  { %374 = vmatprep.subr.bf16.mxu1 %v426_v0  ;;  %390 = vmatprep.mubr.msk.bf16.mxu1 %vm427_vm0, %v426_v0  ;;  %v33_v3 = vld [vmem:[%s545_s0] sm:$0xff]  ;;  %v411_v6 = vld [vmem:[%s546_s3 + $0x8] sm:$0xff]   ;;  %v413_v8 = vld [vmem:[%s546_s3 + $0x18] sm:$0xff]  }
   0x3   :  { %367 = vmatpush3.bf16.msra.mxu0 %v408_v1  ;;  %v410_v4 = vld [vmem:[%s546_s3] sm:$0xff]   ;;  %v34_v5 = vpack.c.bf16 %v33_v3, %v33_v3  ;;  %v415_v10 = vld [vmem:[%s546_s3 + $0x28] sm:$0xff]   ;;  %v416_v11 = vld [vmem:[%s546_s3 + $0x30] sm:$0xff]  }
   0x4   :  { %368 = vmatprep.subr.bf16.mxu0 %v426_v0  ;;  %375 = vmatpush3.bf16.msra.mxu1 %v410_v4  ;;  %v414_v9 = vld [vmem:[%s546_s3 + $0x20] sm:$0xff]   ;;  %v417_v12 = vld [vmem:[%s546_s3 + $0x38] sm:$0xff]   ;;  %v419_v14 = vld [vmem:[%s547_s5 + $0x8] sm:$0xff]  }
   0x5   :  { %376 = vmatprep.subr.bf16.mxu1 %v426_v0  ;;  %v418_v13 = vld [vmem:[%s547_s5] sm:$0xff]   ;;  %v420_v23 = vld [vmem:[%s547_s5 + $0x10] sm:$0xff]   ;;  %v421_v24 = vld [vmem:[%s547_s5 + $0x18] sm:$0xff]  }
   0x6   :  { %v327_v15 = vld [vmem:[%s548_s2] ss:$0 sm:$0xff] }
   0x7   :  { %369 = vmatpush3.bf16.msra.mxu0 %v409_v2  ;;  %v331_v25 = vld [vmem:[%s549_s4] ss:$0 sm:$0xff] }
   0x8   :  { %394 = vmatprep.subr.bf16.mxu0 %v426_v0  ;;  %377 = vmatpush3.bf16.msra.mxu1 %v411_v6  ;;  %v340_v33 = vld [vmem:[%s550_s6] ss:$0 sm:$0xff] }
   0x9   :  { %378 = vmatprep.subr.bf16.mxu1 %v426_v0  ;;  %v347_v42 = vld [vmem:[%s551_s7] ss:$0 sm:$0xff] }
   0xa   :  { %371 = vmatmul.mubr.msk.bf16.vlgmr.msra.gmra.mrb[0].mxu0 %vm58_vm1, %v34_v5  ;;  %v348_v44 = vld [vmem:[%s552_s8] ss:$0 sm:$0xff] }
   0xb   :  { %402 = vmatprep.mubr.msk.bf16.mxu0 %vm427_vm0, %v426_v0  ;;  %395 = vmatpush3.bf16.msra.mxu0 %v418_v13 }
   0xc   :  { %379 = vmatpush3.bf16.msra.mxu1 %v412_v7  ;;  %396 = vmatprep.subr.bf16.mxu0 %v426_v0 }
   0xd   :  { %380 = vmatprep.subr.bf16.mxu1 %v426_v0 }
   0xf   :  { %397 = vmatpush3.bf16.msra.mxu0 %v419_v14 }
  0x10   :  { %381 = vmatpush3.bf16.msra.mxu1 %v413_v8  ;;  %398 = vmatprep.subr.bf16.mxu0 %v426_v0 }
  0x11   :  { %382 = vmatprep.subr.bf16.mxu1 %v426_v0 }
  0x13   :  { %399 = vmatpush3.bf16.msra.mxu0 %v420_v23 }
  0x14   :  { %383 = vmatpush3.bf16.msra.mxu1 %v414_v9  ;;  %400 = vmatprep.subr.bf16.mxu0 %v426_v0 }
  0x15   :  { %384 = vmatprep.subr.bf16.mxu1 %v426_v0 }
  0x17   :  { %401 = vmatpush3.bf16.msra.mxu0 %v421_v24 }
  0x18   :  { %385 = vmatpush3.bf16.msra.mxu1 %v415_v10 }
  0x19   :  { %386 = vmatprep.subr.bf16.mxu1 %v426_v0 }
  0x1c   :  { %387 = vmatpush3.bf16.msra.mxu1 %v416_v11 }
  0x1d   :  { %388 = vmatprep.subr.bf16.mxu1 %v426_v0 }
  0x20   :  { %389 = vmatpush3.bf16.msra.mxu1 %v417_v12 }
  0xdd   :  { %v96_v16 = vpop.f32.mrb[0].mxu0 }
  0xde   :  { %v97_v17 = vadd.f32 %v327_v15, %v96_v16  ;;  %v372_v18 = vpop.f32.mrb[1].mxu0 }
  0xdf   :  { %v99_v19 = vpop.f32.mrb[2].mxu0 }
  0xe0   :  { %v102_v20 = vmax.f32 %v97_v17, 0.0  ;;  %v373_v21 = vpop.f32.mrb[3].mxu0 }
  0xe2   :  { %v103_v22 = vpack.c.bf16 %v102_v20, %v102_v20 }
  0xe4   :  { %391 = vmatmul.mubr.bf16.vlgmr.msra.gmra.mrb[0].mxu1 %v103_v22 }
 0x1b7   :  { %v209_v26 = vpop.f32.mrb[0].mxu1 }
 0x1b8   :  { %v210_v27 = vadd.f32 %v331_v25, %v209_v26  ;;  %v392_v28 = vpop.f32.mrb[1].mxu1 }
 0x1b9   :  { %v212_v29 = vpop.f32.mrb[2].mxu1 }
 0x1ba   :  { %v215_v30 = vmax.f32 %v210_v27, 0.0  ;;  %v393_v31 = vpop.f32.mrb[3].mxu1 }
 0x1bc   :  { %v216_v32 = vpack.c.bf16 %v215_v30, %v215_v30 }
 0x1be   :  { %403 = vmatmul.mubr.msk.bf16.vlgmr.msra.gmra.mrb[4].mxu0 %vm256_vm2, %v216_v32 }
 0x291   :  { %v294_v34 = vpop.f32.mrb[4].mxu0 }
 0x292   :  { %v295_v35 = vadd.f32 %v340_v33, %v294_v34  ;;  %v404_v36 = vpop.f32.mrb[5].mxu0 }
 0x293   :  { %v297_v37 = vpop.f32.mrb[6].mxu0 }
 0x294   :  { %v346_v38 = vmul.f32 -1.442695, %v295_v35  ;;  %v405_v39 = vpop.f32.mrb[7].mxu0 }
 0x296   :  { %422 = vpow2.f32 %v346_v38 }
 0x2a0   :  { %v423_v40 = vpop.eup %422 }
 0x2a1   :  { %v303_v41 = vadd.f32 1.0, %v423_v40 }
 0x2a3   :  { %424 = vrcp.f32 %v303_v41 }
 0x2ad   :  { %v425_v43 = vpop.eup %424 }
 0x2ae   :  { %v313_v45 = vmul.f32 %v425_v43, %v347_v42 }
 0x2b0   :  { %v321_v46 = vadd.f32 %v348_v44, %v313_v45 }
 0x2b2   :  { %322 = vst [vmem:[%s553_s9] sm:$0xff] %v321_v46 }

</bundles_post_ra>
